<compile_context>
chip_gen: v7x
topology: tpu7x:2x2x1
jax: 0.10.0
libtpu: 0.0.40
codegen_flags: <defaults>
</compile_context>

<pallas_src>
import functools

import numpy as np
import jax
import jax.numpy as jnp
from jax import lax
from jax.experimental import pallas as pl
from jax.experimental.pallas import tpu as pltpu


_LANES = 128
_KSIZE = 4          # every conv in CNet/CNet2 uses kernel_size=4
_SLOPE = 0.01       # F.leaky_relu default negative slope


def _round_up(n, m):
    return ((n + m - 1) // m) * m


# ---------------------------------------------------------------------------
# Fused kernel: one grid step = `bb` batch elements, whole network in VMEM.
# Activation row layout everywhere: row = output_row * bb + batch, so every
# im2col slice is a contiguous block of rows and every layer is ONE matmul.
# ---------------------------------------------------------------------------
def _cnet2_fused_kernel(x_ref, t1_ref, b1_ref, t2_ref, b2_ref, t3_ref, b3_ref,
                        wl_ref, bl_ref, o_ref, *, bb, oh1, oh2, oh3):
    f32, bf16 = jnp.float32, jnp.bfloat16

    def lrelu(v):
        return jnp.where(v > 0, v, _SLOPE * v)

    # ---- conv1 (stride 2: H-stride via parity split, W-stride in the slab) ----
    lhs1 = jnp.concatenate(
        [x_ref[0, kh % 2, pl.ds((kh // 2) * bb, oh1 * bb), :]
         for kh in range(_KSIZE)], axis=-1)                          # (bb*oh1, 4*wcp)
    a1 = lrelu(jnp.dot(lhs1.astype(bf16), t1_ref[...],
                       preferred_element_type=f32) + b1_ref[...])    # (bb*oh1, n1) f32

    # ---- conv2 (stride 1) ----
    lhs2 = jnp.concatenate(
        [a1[kh * bb:(kh + oh2) * bb, :] for kh in range(_KSIZE)], axis=-1)
    a2 = lrelu(jnp.dot(lhs2.astype(bf16), t2_ref[...],
                       preferred_element_type=f32) + b2_ref[...])    # (bb*oh2, n2) f32

    # ---- conv3 (stride 1) ----
    lhs3 = jnp.concatenate(
        [a2[kh * bb:(kh + oh3) * bb, :] for kh in range(_KSIZE)], axis=-1)
    a3 = lrelu(jnp.dot(lhs3.astype(bf16), t3_ref[...],
                       preferred_element_type=f32) + b3_ref[...])    # (bb*oh3, n3) f32

    # ---- flatten + Linear: fold the oh3 row blocks into K -> one matmul ----
    lhs_l = jnp.concatenate(
        [a3[o * bb:(o + 1) * bb, :] for o in range(oh3)], axis=-1)   # (bb, oh3*n3)
    y = jnp.dot(lhs_l.astype(bf16), wl_ref[...],
                preferred_element_type=f32) + bl_ref[...]
    o_ref[0] = y                                                     # (bb, 128) lane-dense store


# ---------------------------------------------------------------------------
# One-time parameter packing (done at init, NOT per forward call)
# ---------------------------------------------------------------------------
def _toeplitz_conv(weight, bias, in_width, stride, rows, cols):
    """Expand a conv weight (OC, IC, KH, KW) into a packed (KH*rows, cols)
    matrix: row block kh acts on an activation row laid out as col = w*IC + ic
    and produces output columns col = ow*OC + oc.  rows/cols are zero-padded
    (>= in_width*IC / OW*OC)."""
    wnp = np.asarray(weight, dtype=np.float32)
    OC, IC, KH, KW = wnp.shape
    OW = (in_width - KW) // stride + 1
    assert rows >= in_width * IC and cols >= OW * OC
    T = np.zeros((KH, rows, cols), np.float32)
    for kh in range(KH):
        for kw in range(KW):
            blk = wnp[:, :, kh, kw].T                                # (IC, OC)
            for ow in range(OW):
                w = stride * ow + kw
                T[kh, w * IC:(w + 1) * IC, ow * OC:(ow + 1) * OC] = blk
    bvec = np.zeros((1, cols), np.float32)
    bvec[0, :OW * OC] = np.tile(np.asarray(bias, np.float32), OW)
    return T.reshape(KH * rows, cols), bvec


def cnet2_pack_params(params, input_shape, output_dim):
    """Repack PyTorch-layout params into padded, bf16, kh-folded kernel operands."""
    C, H, W = input_shape
    assert H % 2 == 0, "fused kernel assumes even input height (stride-2 parity split)"
    w1, b1 = params["conv1"]
    w2, b2 = params["conv2"]
    w3, b3 = params["conv3"]
    wo, bo = params["out_layer"]

    oh1, ow1 = (H - _KSIZE) // 2 + 1, (W - _KSIZE) // 2 + 1
    oh2, ow2 = oh1 - (_KSIZE - 1), ow1 - (_KSIZE - 1)
    oh3, ow3 = oh2 - (_KSIZE - 1), ow2 - (_KSIZE - 1)

    wcp = _round_up(W * C, _LANES)
    n1 = _round_up(ow1 * 16, _LANES)
    n2 = _round_up(ow2 * 32, _LANES)
    n3 = _round_up(ow3 * 64, _LANES)
    no = _round_up(output_dim, _LANES)

    t1, bb1 = _toeplitz_conv(w1, b1, in_width=W,   stride=2, rows=wcp, cols=n1)
    t2, bb2 = _toeplitz_conv(w2, b2, in_width=ow1, stride=1, rows=n1,  cols=n2)
    t3, bb3 = _toeplitz_conv(w3, b3, in_width=ow2, stride=1, rows=n2,  cols=n3)

    # Final Linear: fold PyTorch's NCHW flatten order (c, oh, ow) into the
    # packed weight so the kernel's lane-concatenated (oh-block, ow*64 + c)
    # activation layout can be consumed by a single matmul.
    wonp = np.asarray(wo, np.float32)                                # (out_dim, 64*oh3*ow3)
    wl = np.zeros((oh3 * n3, no), np.float32)
    for oh in range(oh3):
        for ow in range(ow3):
            blk = wonp[:, (oh * ow3 + ow)::(oh3 * ow3)].T            # (64, out_dim)
            wl[oh * n3 + ow * 64: oh * n3 + (ow + 1) * 64, :output_dim] = blk
    bl = np.zeros((1, no), np.float32)
    bl[0, :output_dim] = np.asarray(bo, np.float32)

    bf16 = jnp.bfloat16
    return {"t1": jnp.asarray(t1, bf16), "b1": jnp.asarray(bb1),
            "t2": jnp.asarray(t2, bf16), "b2": jnp.asarray(bb2),
            "t3": jnp.asarray(t3, bf16), "b3": jnp.asarray(bb3),
            "wl": jnp.asarray(wl, bf16), "bl": jnp.asarray(bl)}


# ---------------------------------------------------------------------------
# Forward
# ---------------------------------------------------------------------------
def cnet2_forward(packed, x, output_dim, block_b=None):
    """x: (B, C, H, W) float32 -> (B, output_dim) float32."""
    B, C, H, W = x.shape
    oh1, ow1 = (H - _KSIZE) // 2 + 1, (W - _KSIZE) // 2 + 1
    oh2, ow2 = oh1 - (_KSIZE - 1), ow1 - (_KSIZE - 1)
    oh3, ow3 = oh2 - (_KSIZE - 1), ow2 - (_KSIZE - 1)
    wcp = _round_up(W * C, _LANES)

    if block_b is None:
        # Target conv1 matmul M = block_b*oh1 ~ 256 rows, but keep >= 2 grid
        # steps whenever B >= 2 so both TensorCores get work on v7x.
        block_b = max(1, min(max(1, 256 // oh1), -(-B // 2)))
    block_b = max(1, min(block_b, B))
    grid_b = -(-B // block_b)
    bp = grid_b * block_b

    # NCHW -> rows laid out as (w, c) with lanes padded to 128; parity-split H
    # (stride-2) and interleave the batch block under each row so the kernel
    # only ever takes contiguous static row slices.
    x2d = jnp.transpose(x, (0, 2, 3, 1)).reshape(B, H, W * C).astype(jnp.float32)
    if wcp > W * C:
        x2d = jnp.pad(x2d, ((0, 0), (0, 0), (0, wcp - W * C)))
    if bp > B:
        x2d = jnp.pad(x2d, ((0, bp - B), (0, 0), (0, 0)))
    xs = x2d.reshape(grid_b, block_b, H // 2, 2, wcp)
    xs = jnp.transpose(xs, (0, 3, 2, 1, 4))                 # (G, parity, H//2, bb, wcp)
    xs = xs.reshape(grid_b, 2, (H // 2) * block_b, wcp)

    t1, b1 = packed["t1"], packed["b1"]
    t2, b2 = packed["t2"], packed["b2"]
    t3, b3 = packed["t3"], packed["b3"]
    wl, bl = packed["wl"], packed["bl"]
    no = bl.shape[1]

    kernel = functools.partial(_cnet2_fused_kernel, bb=block_b,
                               oh1=oh1, oh2=oh2, oh3=oh3)

    # Advisory cost: true conv/linear FLOPs (not padded Toeplitz dims).
    flops = 2 * B * (oh1 * ow1 * 16 * (C * _KSIZE * _KSIZE)
                     + oh2 * ow2 * 32 * (16 * _KSIZE * _KSIZE)
                     + oh3 * ow3 * 64 * (32 * _KSIZE * _KSIZE)
                     + output_dim * (64 * oh3 * ow3))
    bytes_accessed = (int(np.prod(xs.shape)) * 4 + bp * no * 4
                      + sum(int(a.size) * a.dtype.itemsize
                            for a in (t1, b1, t2, b2, t3, b3, wl, bl)))

    def full(a):
        nd = a.ndim
        return pl.BlockSpec(a.shape, lambda g, _nd=nd: (0,) * _nd)

    out = pl.pallas_call(
        kernel,
        out_shape=jax.ShapeDtypeStruct((grid_b, block_b, no), jnp.float32),
        grid=(grid_b,),
        in_specs=[
            pl.BlockSpec((1,) + xs.shape[1:], lambda g: (g, 0, 0, 0)),
            full(t1), full(b1), full(t2), full(b2), full(t3), full(b3),
            full(wl), full(bl),
        ],
        out_specs=pl.BlockSpec((1, block_b, no), lambda g: (g, 0, 0)),
        compiler_params=pltpu.CompilerParams(dimension_semantics=("parallel",)),
        cost_estimate=pl.CostEstimate(flops=flops, transcendentals=0,
                                      bytes_accessed=bytes_accessed),
    )(xs, t1, b1, t2, b2, t3, b3, wl, bl)

    return out.reshape(bp, no)[:B, :output_dim]


# ---------------------------------------------------------------------------
# Init (PyTorch-like) + pure-JAX reference for the correctness check
# ---------------------------------------------------------------------------
def cnet2_init_params(key, input_shape, output_dim):
    C, H, W = input_shape

    def conv_params(k, in_c, out_c, ksize):
        kw_, kb_ = jax.random.split(k)
        bound = 1.0 / ((in_c * ksize * ksize) ** 0.5)
        w = jax.random.uniform(kw_, (out_c, in_c, ksize, ksize), jnp.float32, -bound, bound)
        b = jax.random.uniform(kb_, (out_c,), jnp.float32, -bound, bound)
        return w, b

    def linear_params(k, in_f, out_f):
        kw_, kb_ = jax.random.split(k)
        bound = 1.0 / (in_f ** 0.5)
        w = jax.random.uniform(kw_, (out_f, in_f), jnp.float32, -bound, bound)
        b = jax.random.uniform(kb_, (out_f,), jnp.float32, -bound, bound)
        return w, b

    k1, k2, k3, k4 = jax.random.split(key, 4)
    params = {
        "conv1": conv_params(k1, C, 16, _KSIZE),
        "conv2": conv_params(k2, 16, 32, _KSIZE),
        "conv3": conv_params(k3, 32, 64, _KSIZE),
    }
    h, w = (H - _KSIZE) // 2 + 1, (W - _KSIZE) // 2 + 1
    h, w = h - (_KSIZE - 1), w - (_KSIZE - 1)
    h, w = h - (_KSIZE - 1), w - (_KSIZE - 1)
    params["out_layer"] = linear_params(k4, 64 * h * w, output_dim)
    return params


def cnet2_forward_reference(params, x):
    def lrelu(v):
        return jnp.where(v > 0, v, _SLOPE * v)

    dn = ("NCHW", "OIHW", "NCHW")
    w1, b1 = params["conv1"]
    w2, b2 = params["conv2"]
    w3, b3 = params["conv3"]
    wo, bo = params["out_layer"]
    y = lax.conv_general_dilated(x, w1, (2, 2), "VALID", dimension_numbers=dn,
                                 precision=lax.Precision.HIGHEST)
    y = lrelu(y + b1[None, :, None, None])
    y = lax.conv_general_dilated(y, w2, (1, 1), "VALID", dimension_numbers=dn,
                                 precision=lax.Precision.HIGHEST)
    y = lrelu(y + b2[None, :, None, None])
    y = lax.conv_general_dilated(y, w3, (1, 1), "VALID", dimension_numbers=dn,
                                 precision=lax.Precision.HIGHEST)
    y = lrelu(y + b3[None, :, None, None])
    y = y.reshape(x.shape[0], -1)
    return jnp.dot(y, wo.T, precision=lax.Precision.HIGHEST) + bo


if __name__ == "__main__":
    key = jax.random.PRNGKey(0)
    k_params, k_x = jax.random.split(key)

    input_shape = (4, 16, 16)    # (C, H, W): conv stack reduces to 64 features
    output_dim = 8

    params = cnet2_init_params(k_params, input_shape, output_dim)
    packed = cnet2_pack_params(params, input_shape, output_dim)

    fwd = jax.jit(cnet2_forward, static_argnums=(2, 3))

    # Required small-shape check (B=2 -> block_b=1, 2 "parallel" grid steps).
    # Tolerance reflects the bf16 MXU path (weights + matmul lhs in bf16,
    # f32 accumulation / epilogue).
    x = jax.random.normal(k_x, (2,) + input_shape, dtype=jnp.float32)
    out = jax.block_until_ready(fwd(packed, x, output_dim, None))
    assert out.shape == (2, output_dim), out.shape
    ref = jax.block_until_ready(cnet2_forward_reference(params, x))
    err = float(jnp.max(jnp.abs(out - ref)))
    assert err < 3e-2, f"max abs error vs reference (B=2): {err}"

    # Exercise the batch-blocked path (B=16 -> block_b=8, M = 8*oh per matmul).
    xb = jax.random.normal(jax.random.PRNGKey(1), (16,) + input_shape, dtype=jnp.float32)
    outb = jax.block_until_ready(fwd(packed, xb, output_dim, None))
    assert outb.shape == (16, output_dim), outb.shape
    refb = jax.block_until_ready(cnet2_forward_reference(params, xb))
    errb = float(jnp.max(jnp.abs(outb - refb)))
    assert errb < 3e-2, f"max abs error vs reference (B=16): {errb}"

    print("KERNEL_OK")
</pallas_src>

<mosaic_0001>
module attributes {stable_mosaic.version = 11 : i64} {
  func.func @_cnet2_fused_kernel(%arg0: i32, %arg1: memref<1x2x8x128xf32, #tpu.memory_space<vmem>>, %arg2: memref<512x128xbf16, #tpu.memory_space<vmem>>, %arg3: memref<1x128xf32, #tpu.memory_space<vmem>>, %arg4: memref<512x128xbf16, #tpu.memory_space<vmem>>, %arg5: memref<1x128xf32, #tpu.memory_space<vmem>>, %arg6: memref<512x128xbf16, #tpu.memory_space<vmem>>, %arg7: memref<1x128xf32, #tpu.memory_space<vmem>>, %arg8: memref<128x128xbf16, #tpu.memory_space<vmem>>, %arg9: memref<1x128xf32, #tpu.memory_space<vmem>>, %arg10: memref<1x1x128xf32, #tpu.memory_space<vmem>>) attributes {dimension_semantics = [#tpu.dimension_semantics<parallel>], iteration_bounds = array<i64: 2>, scalar_prefetch = 0 : i64, scratch_operands = 0 : i64, tpu.core_type = #tpu.core_type<tc>, window_params = [{transform_indices = @transform_0, window_bounds = array<i64: 1, 2, 8, 128>}, {pipeline_mode = #tpu.pipeline_mode<synchronous>, transform_indices = @transform_1, window_bounds = array<i64: 512, 128>}, {pipeline_mode = #tpu.pipeline_mode<synchronous>, transform_indices = @transform_2, window_bounds = array<i64: 1, 128>}, {pipeline_mode = #tpu.pipeline_mode<synchronous>, transform_indices = @transform_3, window_bounds = array<i64: 512, 128>}, {pipeline_mode = #tpu.pipeline_mode<synchronous>, transform_indices = @transform_4, window_bounds = array<i64: 1, 128>}, {pipeline_mode = #tpu.pipeline_mode<synchronous>, transform_indices = @transform_5, window_bounds = array<i64: 512, 128>}, {pipeline_mode = #tpu.pipeline_mode<synchronous>, transform_indices = @transform_6, window_bounds = array<i64: 1, 128>}, {pipeline_mode = #tpu.pipeline_mode<synchronous>, transform_indices = @transform_7, window_bounds = array<i64: 128, 128>}, {pipeline_mode = #tpu.pipeline_mode<synchronous>, transform_indices = @transform_8, window_bounds = array<i64: 1, 128>}, {transform_indices = @transform_9, window_bounds = array<i64: 1, 1, 128>}]} {
    %c0 = arith.constant 0 : index
    %c0_0 = arith.constant 0 : index
    %c0_1 = arith.constant 0 : index
    %c0_2 = arith.constant 0 : index
    %0 = vector.load %arg1[%c0, %c0_0, %c0_1, %c0_2] : memref<1x2x8x128xf32, #tpu.memory_space<vmem>>, vector<1x1x7x128xf32>
    %1 = vector.shape_cast %0 : vector<1x1x7x128xf32> to vector<7x128xf32>
    %c0_3 = arith.constant 0 : index
    %c1 = arith.constant 1 : index
    %c0_4 = arith.constant 0 : index
    %c0_5 = arith.constant 0 : index
    %2 = vector.load %arg1[%c0_3, %c1, %c0_4, %c0_5] : memref<1x2x8x128xf32, #tpu.memory_space<vmem>>, vector<1x1x7x128xf32>
    %3 = vector.shape_cast %2 : vector<1x1x7x128xf32> to vector<7x128xf32>
    %c0_6 = arith.constant 0 : index
    %c0_7 = arith.constant 0 : index
    %c1_8 = arith.constant 1 : index
    %c0_9 = arith.constant 0 : index
    %4 = vector.load %arg1[%c0_6, %c0_7, %c1_8, %c0_9] : memref<1x2x8x128xf32, #tpu.memory_space<vmem>>, vector<1x1x7x128xf32>
    %5 = vector.shape_cast %4 : vector<1x1x7x128xf32> to vector<7x128xf32>
    %c0_10 = arith.constant 0 : index
    %c1_11 = arith.constant 1 : index
    %c1_12 = arith.constant 1 : index
    %c0_13 = arith.constant 0 : index
    %6 = vector.load %arg1[%c0_10, %c1_11, %c1_12, %c0_13] : memref<1x2x8x128xf32, #tpu.memory_space<vmem>>, vector<1x1x7x128xf32>
    %7 = vector.shape_cast %6 : vector<1x1x7x128xf32> to vector<7x128xf32>
    %8 = tpu.concatenate %1, %3, %5, %7 in 1 : vector<7x128xf32>, vector<7x128xf32>, vector<7x128xf32>, vector<7x128xf32> -> vector<7x512xf32>
    %9 = arith.truncf %8 : vector<7x512xf32> to vector<7x512xbf16>
    %c0_14 = arith.constant 0 : index
    %c0_15 = arith.constant 0 : index
    %10 = vector.load %arg2[%c0_14, %c0_15] : memref<512x128xbf16, #tpu.memory_space<vmem>>, vector<512x128xbf16>
    %cst = arith.constant dense<0.000000e+00> : vector<7x128xf32>
    %11 = tpu.matmul %9, %10, %cst {dimension_numbers = #tpu.dot_dimension_numbers<[1], [0], [0], [1], [0, 0, 1, 1], [], []>} : vector<7x512xbf16>, vector<512x128xbf16>, vector<7x128xf32> -> vector<7x128xf32>
    %c0_16 = arith.constant 0 : index
    %c0_17 = arith.constant 0 : index
    %12 = vector.load %arg3[%c0_16, %c0_17] : memref<1x128xf32, #tpu.memory_space<vmem>>, vector<1x128xf32>
    %13 = vector.broadcast %12 : vector<1x128xf32> to vector<7x128xf32>
    %14 = arith.addf %11, %13 : vector<7x128xf32>
    %cst_18 = arith.constant 0.000000e+00 : f32
    %15 = vector.broadcast %cst_18 : f32 to vector<7x128xf32>
    %16 = arith.cmpf ogt, %14, %15 : vector<7x128xf32>
    %cst_19 = arith.constant 0.00999999977 : f32
    %17 = vector.broadcast %cst_19 : f32 to vector<7x128xf32>
    %18 = arith.mulf %17, %14 : vector<7x128xf32>
    %19 = arith.select %16, %14, %18 : vector<7x128xi1>, vector<7x128xf32>
    %20 = vector.extract_strided_slice %19 {offsets = [0, 0], sizes = [4, 128], strides = [1, 1]} : vector<7x128xf32> to vector<4x128xf32>
    %21 = vector.extract_strided_slice %19 {offsets = [1, 0], sizes = [4, 128], strides = [1, 1]} : vector<7x128xf32> to vector<4x128xf32>
    %22 = vector.extract_strided_slice %19 {offsets = [2, 0], sizes = [4, 128], strides = [1, 1]} : vector<7x128xf32> to vector<4x128xf32>
    %23 = vector.extract_strided_slice %19 {offsets = [3, 0], sizes = [4, 128], strides = [1, 1]} : vector<7x128xf32> to vector<4x128xf32>
    %24 = tpu.concatenate %20, %21, %22, %23 in 1 : vector<4x128xf32>, vector<4x128xf32>, vector<4x128xf32>, vector<4x128xf32> -> vector<4x512xf32>
    %25 = arith.truncf %24 : vector<4x512xf32> to vector<4x512xbf16>
    %c0_20 = arith.constant 0 : index
    %c0_21 = arith.constant 0 : index
    %26 = vector.load %arg4[%c0_20, %c0_21] : memref<512x128xbf16, #tpu.memory_space<vmem>>, vector<512x128xbf16>
    %cst_22 = arith.constant dense<0.000000e+00> : vector<4x128xf32>
    %27 = tpu.matmul %25, %26, %cst_22 {dimension_numbers = #tpu.dot_dimension_numbers<[1], [0], [0], [1], [0, 0, 1, 1], [], []>} : vector<4x512xbf16>, vector<512x128xbf16>, vector<4x128xf32> -> vector<4x128xf32>
    %c0_23 = arith.constant 0 : index
    %c0_24 = arith.constant 0 : index
    %28 = vector.load %arg5[%c0_23, %c0_24] : memref<1x128xf32, #tpu.memory_space<vmem>>, vector<1x128xf32>
    %29 = vector.broadcast %28 : vector<1x128xf32> to vector<4x128xf32>
    %30 = arith.addf %27, %29 : vector<4x128xf32>
    %cst_25 = arith.constant 0.000000e+00 : f32
    %31 = vector.broadcast %cst_25 : f32 to vector<4x128xf32>
    %32 = arith.cmpf ogt, %30, %31 : vector<4x128xf32>
    %cst_26 = arith.constant 0.00999999977 : f32
    %33 = vector.broadcast %cst_26 : f32 to vector<4x128xf32>
    %34 = arith.mulf %33, %30 : vector<4x128xf32>
    %35 = arith.select %32, %30, %34 : vector<4x128xi1>, vector<4x128xf32>
    %36 = vector.extract_strided_slice %35 {offsets = [0, 0], sizes = [1, 128], strides = [1, 1]} : vector<4x128xf32> to vector<1x128xf32>
    %37 = vector.extract_strided_slice %35 {offsets = [1, 0], sizes = [1, 128], strides = [1, 1]} : vector<4x128xf32> to vector<1x128xf32>
    %38 = vector.extract_strided_slice %35 {offsets = [2, 0], sizes = [1, 128], strides = [1, 1]} : vector<4x128xf32> to vector<1x128xf32>
    %39 = vector.extract_strided_slice %35 {offsets = [3, 0], sizes = [1, 128], strides = [1, 1]} : vector<4x128xf32> to vector<1x128xf32>
    %40 = tpu.concatenate %36, %37, %38, %39 in 1 : vector<1x128xf32>, vector<1x128xf32>, vector<1x128xf32>, vector<1x128xf32> -> vector<1x512xf32>
    %41 = arith.truncf %40 : vector<1x512xf32> to vector<1x512xbf16>
    %c0_27 = arith.constant 0 : index
    %c0_28 = arith.constant 0 : index
    %42 = vector.load %arg6[%c0_27, %c0_28] : memref<512x128xbf16, #tpu.memory_space<vmem>>, vector<512x128xbf16>
    %cst_29 = arith.constant dense<0.000000e+00> : vector<1x128xf32>
    %43 = tpu.matmul %41, %42, %cst_29 {dimension_numbers = #tpu.dot_dimension_numbers<[1], [0], [0], [1], [0, 0, 1, 1], [], []>} : vector<1x512xbf16>, vector<512x128xbf16>, vector<1x128xf32> -> vector<1x128xf32>
    %c0_30 = arith.constant 0 : index
    %c0_31 = arith.constant 0 : index
    %44 = vector.load %arg7[%c0_30, %c0_31] : memref<1x128xf32, #tpu.memory_space<vmem>>, vector<1x128xf32>
    %45 = arith.addf %43, %44 : vector<1x128xf32>
    %cst_32 = arith.constant 0.000000e+00 : f32
    %46 = vector.broadcast %cst_32 : f32 to vector<1x128xf32>
    %47 = arith.cmpf ogt, %45, %46 : vector<1x128xf32>
    %cst_33 = arith.constant 0.00999999977 : f32
    %48 = vector.broadcast %cst_33 : f32 to vector<1x128xf32>
    %49 = arith.mulf %48, %45 : vector<1x128xf32>
    %50 = arith.select %47, %45, %49 : vector<1x128xi1>, vector<1x128xf32>
    %51 = arith.truncf %50 : vector<1x128xf32> to vector<1x128xbf16>
    %c0_34 = arith.constant 0 : index
    %c0_35 = arith.constant 0 : index
    %52 = vector.load %arg8[%c0_34, %c0_35] : memref<128x128xbf16, #tpu.memory_space<vmem>>, vector<128x128xbf16>
    %cst_36 = arith.constant dense<0.000000e+00> : vector<1x128xf32>
    %53 = tpu.matmul %51, %52, %cst_36 {dimension_numbers = #tpu.dot_dimension_numbers<[1], [0], [0], [1], [0, 0, 1, 1], [], []>} : vector<1x128xbf16>, vector<128x128xbf16>, vector<1x128xf32> -> vector<1x128xf32>
    %c0_37 = arith.constant 0 : index
    %c0_38 = arith.constant 0 : index
    %54 = vector.load %arg9[%c0_37, %c0_38] : memref<1x128xf32, #tpu.memory_space<vmem>>, vector<1x128xf32>
    %55 = arith.addf %53, %54 : vector<1x128xf32>
    %c0_39 = arith.constant 0 : index
    %c0_40 = arith.constant 0 : index
    %c0_41 = arith.constant 0 : index
    %56 = vector.load %arg10[%c0_39, %c0_40, %c0_41] : memref<1x1x128xf32, #tpu.memory_space<vmem>>, vector<1x1x128xf32>
    %57 = vector.shape_cast %56 : vector<1x1x128xf32> to vector<1x128xf32>
    %58 = vector.shape_cast %55 : vector<1x128xf32> to vector<1x1x128xf32>
    tpu.vector_store %arg10[%c0_39, %c0_40, %c0_41], %58 {strides = array<i32>} : memref<1x1x128xf32, #tpu.memory_space<vmem>>, vector<1x1x128xf32>,
    return
  }
  func.func @transform_0(%arg0: i32) -> (i32, i32, i32, i32) {
    %c0_i32 = arith.constant 0 : i32
    %c0_i32_0 = arith.constant 0 : i32
    %c0_i32_1 = arith.constant 0 : i32
    %c0_i32_2 = arith.constant 0 : i32
    return %arg0, %c0_i32, %c0_i32_0, %c0_i32_1 : i32, i32, i32, i32
  }
  func.func @transform_1(%arg0: i32) -> (i32, i32) {
    %c0_i32 = arith.constant 0 : i32
    %c0_i32_0 = arith.constant 0 : i32
    %c0_i32_1 = arith.constant 0 : i32
    return %c0_i32, %c0_i32_0 : i32, i32
  }
  func.func @transform_2(%arg0: i32) -> (i32, i32) {
    %c0_i32 = arith.constant 0 : i32
    %c0_i32_0 = arith.constant 0 : i32
    %c0_i32_1 = arith.constant 0 : i32
    return %c0_i32, %c0_i32_0 : i32, i32
  }
  func.func @transform_3(%arg0: i32) -> (i32, i32) {
    %c0_i32 = arith.constant 0 : i32
    %c0_i32_0 = arith.constant 0 : i32
    %c0_i32_1 = arith.constant 0 : i32
    return %c0_i32, %c0_i32_0 : i32, i32
  }
  func.func @transform_4(%arg0: i32) -> (i32, i32) {
    %c0_i32 = arith.constant 0 : i32
    %c0_i32_0 = arith.constant 0 : i32
    %c0_i32_1 = arith.constant 0 : i32
    return %c0_i32, %c0_i32_0 : i32, i32
  }
  func.func @transform_5(%arg0: i32) -> (i32, i32) {
    %c0_i32 = arith.constant 0 : i32
    %c0_i32_0 = arith.constant 0 : i32
    %c0_i32_1 = arith.constant 0 : i32
    return %c0_i32, %c0_i32_0 : i32, i32
  }
  func.func @transform_6(%arg0: i32) -> (i32, i32) {
    %c0_i32 = arith.constant 0 : i32
    %c0_i32_0 = arith.constant 0 : i32
    %c0_i32_1 = arith.constant 0 : i32
    return %c0_i32, %c0_i32_0 : i32, i32
  }
  func.func @transform_7(%arg0: i32) -> (i32, i32) {
    %c0_i32 = arith.constant 0 : i32
    %c0_i32_0 = arith.constant 0 : i32
    %c0_i32_1 = arith.constant 0 : i32
    return %c0_i32, %c0_i32_0 : i32, i32
  }
  func.func @transform_8(%arg0: i32) -> (i32, i32) {
    %c0_i32 = arith.constant 0 : i32
    %c0_i32_0 = arith.constant 0 : i32
    %c0_i32_1 = arith.constant 0 : i32
    return %c0_i32, %c0_i32_0 : i32, i32
  }
  func.func @transform_9(%arg0: i32) -> (i32, i32, i32) {
    %c0_i32 = arith.constant 0 : i32
    %c0_i32_0 = arith.constant 0 : i32
    %c0_i32_1 = arith.constant 0 : i32
    return %arg0, %c0_i32, %c0_i32_0 : i32, i32, i32
  }
}

</mosaic_0001>

<bundles_post_ra>
// kernel: cnet2_forward.1
= control target key start
LH: loop header
LB: loop body
LE: loop exit
PB: predicated region body
PF: predicated region fallthrough
CT: control target
= control target key end

     0   :  { %14 = vsyncpa [#allocation3], 0  ;;  %s2550_s0 = inlined_call_operand.vmem [shape: f32[2,2,8,128], index: 0, kind: input, shape index: {}]   ;;  %s2551_s1 = inlined_call_operand.vmem [shape: bf16[512,128], index: 1, kind: input, shape index: {}]   ;;  %s2552_s2 = inlined_call_operand.vmem [shape: f32[1,128], index: 2, kind: input, shape index: {}]   ;;  %s2553_s3 = inlined_call_operand.vmem [shape: bf16[512,128], index: 3, kind: input, shape index: {}]   ;;  %s2554_s4 = inlined_call_operand.vmem [shape: f32[1,128], index: 4, kind: input, shape index: {}]   ;;  %s2555_s5 = inlined_call_operand.hbm [shape: bf16[512,128], index: 5, kind: input, shape index: {}]   ;;  %s2556_s6 = inlined_call_operand.vmem [shape: f32[1,128], index: 6, kind: input, shape index: {}]   ;;  %s2557_s7 = inlined_call_operand.vmem [shape: bf16[128,128], index: 7, kind: input, shape index: {}]   ;;  %s2558_s8 = inlined_call_operand.vmem [shape: f32[1,128], index: 8, kind: input, shape index: {}]   ;;  %s2559_s9 = inlined_call_operand.hbm [shape: f32[2,1,128], index: 9, kind: output, shape index: {}]  }
   0x1   :  { %15 = vsyncpa [#allocation4], 0 }
   0x2   :  { %17 = vsyncpa [#allocation4 + $0x1], 0  ;;  %s2187_s30 = smov 0   ;;  %s2189_s10 = smov 0  }
   0x3   :  { %s2191_s11 = smov 0   ;;  %s2193_s12 = smov 0  }
   0x4 LB: > { %s2208_s13 = sadd.s32 4294967295, %s2129_s12   ;;  %s1596_s14 = sadd.s32 4294967294, %s2129_s12   ;;  %s2129_s12 = sphi %s2193_s12, %s2575_s12   ;;  %s2125_s11 = sphi %s2191_s11, %s2574_s11   ;;  %s2121_s10 = sphi %s2189_s10, %s2573_s10   ;;  %s2117_s30 = sphi %s2187_s30, %s2572_s30  }
   0x5   : > { %s2212_s15 = sadd.s32 1, %s2129_s12   ;;  %s224_s16 = sadd.s32 1, %s2125_s11 }
   0x6   : > { %s221_s17 = ssub.s32 %s2129_s12, %s2212_s15  ;;  %p234_p0 = scmp.ne.s32.totalorder %s2125_s11, %s2121_s10 }
   0x7   : > { %p222_p1 = scmp.eq.s32.totalorder %s221_s17, 0  ;;  %p235_p2 = scmp.eq.s32.totalorder %s2208_s13, 1 }
   0x8   : > { %p240_p3 = scmp.ne.s32.totalorder %s2121_s10, %s2117_s30  ;;  %p241_p4 = scmp.eq.s32.totalorder %s1596_s14, 1 }
   0x9   : > { %s2223_s18 = scalar_select %p222_p1, %s2125_s11, %s224_s16  }
   0xa   : > { %p2225_p5 = por %p235_p2, %p234_p0  ;;  %p2229_p6 = por %p241_p4, %p240_p3 }
   0xb   : > { %p1597_p7 = scmp.ge.s32.totalorder %s2129_s12, 1  ;;  %p248_p8 = scmp.lt.s32.totalorder %s2129_s12, 3 }
   0xc   : > { %s2563_s19 = scalar_select %p2225_p5, 1, 0 }
   0xd   : > { %s2564_s20 = scalar_select %p2229_p6, 1, 0 }
   0xe   : > { %p2560_p9 = scmp.eq.s32.totalorder %s2208_s13, 0  ;;  %p2236_p10 = pnand %p1597_p7, %p248_p8 }
   0xf   : > { %s2131_s22 = smov [#allocation2]   ;;  %s2035_s27 = scalar_lea.hbm %s2555_s5, 4096 }
  0x10   : > { %s2565_s21 = scalar_select %p2236_p10, 1, 0 }
  0x11   : > { %s272_s23 = sshll.u32 %s2131_s22, 4  ;;  %p1883_p11 = pneg %p2236_p10  ;;  %s273_s23 = int_to_ptr.vmem [resolvable:$true] %s272_s23 }
  0x12   : > { %p2036_p13 = scmp.ne.s32.totalorder %s2555_s5, %s2035_s27  ;;  %p2042_p3 = scmp.lt.u32.totalorder %s2035_s27, %s2555_s5 }
  0x13   : > { %p2244_p12 = pnand %p2560_p9, %p1883_p11 }
  0x15   : > { %p2037_p0 = pneg %p2244_p12 }
  0x17   : > { %p2038_p1 = pnand %p2037_p0, %p2036_p13 }
  0x19   : > { %p2039_p2 = pneg %p2038_p1 }
  0x1b   : > { %p2044_p4 = pnand %p2042_p3, %p2039_p2 }
  0x1d   : > { %2047 = shalt.err (!%p2044_p4)
}
  0x1e   : > { %s2048_s17 = scalar_lea.vmem %s273_s23, 4096  ;;  %p2056_p9 = scmp.lt.s32.totalorder %s273_s23, %s273_s23 }
  0x1f   : > { %p2049_p7 = scmp.ne.s32.totalorder %s273_s23, %s2048_s17  ;;  %p2057_p6 = scmp.lt.s32.totalorder %s2048_s17, %s2048_s17 }
  0x21   : > { %p2051_p8 = pnand %p2049_p7, %p2037_p0  ;;  %p2058_p5 = por %p2057_p6, %p2056_p9 }
  0x23   : > { %p2052_p11 = pneg %p2051_p8 }
  0x25   : > { %p2059_p10 = pnand %p2058_p5, %p2052_p11 }
  0x27   : > { %2062 = shalt.err (!%p2059_p10)
}
  0x28   : > { %s2132_s22 = smov 64   ;;  %s2133_s25 = smov 4  }
  0x29   : > { %1886 = dma.hbm_to_vmem [thread:$0]  (!%p2244_p12), %s2555_s5, 4096, %s273_s23, [#allocation3], %s2132_s22, %s2132_s22, %s2133_s25  }
  0x2a   : > { %p2567_p13 = scmp.ne.s32.totalorder %s2565_s21, 0 }
  0x2b   : > { %p2568_p1 = scmp.eq.s32.totalorder (!%p2567_p13), %s2208_s13, 0 }
  0x2c   : > { %305 = sbr.rel (%p2567_p13) target bundleno = 992 (0x3e0), region = 56 }
  0x33   : > { %2108 = dma.done.wait (%p2568_p1), [#allocation3], 4096   ;;  %p2569_p0 = pmov %p2568_p1 }
  0x34   : > { %v1931_v0 = vld [vmem:[%s2551_s1 + $0x40] sm:$0xff]   ;;  %v1935_v4 = vld [vmem:[%s2551_s1 + $0x48] sm:$0xff]   ;;  %v1939_v8 = vld [vmem:[%s2551_s1 + $0x50] sm:$0xff]   ;;  %p340_p5 = scmp.lt.s32.totalorder %s2208_s13, 1  ;;  %vm2135_vm2 = vmmov 0   ;;  %s338_s27 = sand.u32 1, %s2121_s10  }
  0x35   : > { %2110 = vsyncadd (%p2569_p0), [#allocation3], 4294963200  ;;  %v1932_v1 = vld [vmem:[%s2551_s1 + $0xc0] sm:$0xff]   ;;  %1716 = vmatprep.subr.bf16.mxu0 %v1931_v0  ;;  %v1936_v5 = vld [vmem:[%s2551_s1 + $0xc8] sm:$0xff]   ;;  %s1712_s16 = sshll.u32 %s2208_s13, 4  ;;  %s339_s24 = scalar_lea.vmem [#allocation5], %s338_s27 }
  0x36   : > { %v1933_v2 = vld [vmem:[%s2551_s1] sm:$0xff]   ;;  %1738 = vmatprep.subr.bf16.mxu1 %v1932_v1  ;;  %v1937_v6 = vld [vmem:[%s2551_s1 + $0x8] sm:$0xff]   ;;  %v1940_v9 = vld [vmem:[%s2551_s1 + $0xd0] sm:$0xff]   ;;  %s341_s26 = scalar_select %p340_p5, %s2208_s13, 1 }
  0x37   : > { %v1934_v3 = vld [vmem:[%s2551_s1 + $0x80] sm:$0xff]   ;;  %1717 = vmatpush3.bf16.msra.mxu0 %v1933_v2  ;;  %v1938_v7 = vld [vmem:[%s2551_s1 + $0x88] sm:$0xff]   ;;  %v1941_v10 = vld [vmem:[%s2551_s1 + $0x10] sm:$0xff]   ;;  %s2508_s22 = scalar_lea.hbm %s2559_s9, %s1712_s16  ;;  %s1517_s25 = scalar_lea.sflag [#allocation4], %s338_s27 }
  0x38   : > { %1739 = vmatpush3.bf16.msra.mxu1 %v1934_v3  ;;  %1718 = vmatprep.subr.bf16.mxu0 %v1935_v4  ;;  %v1942_v11 = vld [vmem:[%s2551_s1 + $0x90] sm:$0xff]   ;;  %v1943_v12 = vld [vmem:[%s2551_s1 + $0x58] sm:$0xff]   ;;  %v1947_v16 = vld [vmem:[%s2551_s1 + $0x60] sm:$0xff]   ;;  %s1715_s17 = sshll.u32 %s341_s26, 4  ;;  %p2570_p9 = scmp.ne.s32.totalorder %s2563_s19, 0 }
  0x39   : > { %1740 = vmatprep.subr.bf16.mxu1 %v1936_v5  ;;  %v1944_v13 = vld [vmem:[%s2551_s1 + $0xd8] sm:$0xff]   ;;  %v1948_v17 = vld [vmem:[%s2551_s1 + $0xe0] sm:$0xff]   ;;  %v1951_v20 = vld [vmem:[%s2551_s1 + $0x68] sm:$0xff]   ;;  %s344_s23 = scalar_lea.vmem %s2550_s0, %s1715_s17  ;;  %s2136_s17 = smov [#allocation5]  }
  0x3a   : > { %v1945_v14 = vld [vmem:[%s2551_s1 + $0x18] sm:$0xff]   ;;  %v1949_v18 = vld [vmem:[%s2551_s1 + $0x20] sm:$0xff]   ;;  %v1952_v21 = vld [vmem:[%s2551_s1 + $0xe8] sm:$0xff]   ;;  %s2067_s28 = sshll.u32 %s2136_s17, 4  ;;  %s2068_s28 = int_to_ptr.vmem [resolvable:$false] %s2067_s28 }
  0x3b   : > { %1719 = vmatpush3.bf16.msra.mxu0 %v1937_v6  ;;  %v1946_v15 = vld [vmem:[%s2551_s1 + $0x98] sm:$0xff]   ;;  %v1950_v19 = vld [vmem:[%s2551_s1 + $0xa0] sm:$0xff]   ;;  %v1953_v22 = vld [vmem:[%s2551_s1 + $0x28] sm:$0xff]   ;;  %s2069_s29 = scalar_lea.vmem %s2068_s28, 32 }
  0x3c   : > { %1741 = vmatpush3.bf16.msra.mxu1 %v1938_v7  ;;  %1720 = vmatprep.subr.bf16.mxu0 %v1939_v8  ;;  %v1954_v23 = vld [vmem:[%s2551_s1 + $0xa8] sm:$0xff]   ;;  %v1955_v24 = vld [vmem:[%s2551_s1 + $0x70] sm:$0xff]   ;;  %v1959_v28 = vld [vmem:[%s2551_s1 + $0x78] sm:$0xff]  }
  0x3d   : > { %1742 = vmatprep.subr.bf16.mxu1 %v1940_v9  ;;  %v1956_v25 = vld [vmem:[%s2551_s1 + $0xf0] sm:$0xff]   ;;  %v1960_v29 = vld [vmem:[%s2551_s1 + $0xf8] sm:$0xff]   ;;  %v1604_v32 = vld [vmem:[%s344_s23 + $0x8] sm:$0x7f] }
  0x3e   : > { %v1957_v26 = vld [vmem:[%s2551_s1 + $0x30] sm:$0xff]   ;;  %v1961_v30 = vld [vmem:[%s2551_s1 + $0x38] sm:$0xff]   ;;  %v1605_v33 = vld [vmem:[%s344_s23 + $0x9] sm:$0x7f]  ;;  %v352_v35 = vpack.c.bf16 %v1604_v32, %v1604_v32 }
  0x3f   : > { %1721 = vmatpush3.bf16.msra.mxu0 %v1941_v10  ;;  %v1958_v27 = vld [vmem:[%s2551_s1 + $0xb0] sm:$0xff]   ;;  %v1962_v31 = vld [vmem:[%s2551_s1 + $0xb8] sm:$0xff]   ;;  %v346_v34 = vld [vmem:[%s344_s23] sm:$0x7f]  ;;  %v354_v36 = vpack.c.bf16 %v1605_v33, %v1605_v33 }
  0x40   : > { %1743 = vmatpush3.bf16.msra.mxu1 %v1942_v11  ;;  %1722 = vmatprep.subr.bf16.mxu0 %v1943_v12  ;;  %v351_v37 = vpack.c.bf16 %v346_v34, %v346_v34  ;;  %v349_v38 = vld [vmem:[%s344_s23 + $0x1] sm:$0x7f]  ;;  %v1967_v44 = vld [vmem:[%s2553_s3 + $0x48] sm:$0xff]   ;;  %v1971_v48 = vld [vmem:[%s2553_s3 + $0x50] sm:$0xff]   ;;  %s1529_s23 = sshll.u32 %s339_s24, 4  ;;  %s2510_s23 = int_to_ptr.vmem [resolvable:$true] %s1529_s23 }
  0x41   : > { %1744 = vmatprep.subr.bf16.mxu1 %v1944_v13  ;;  %v353_v39 = vpack.c.bf16 %v349_v38, %v349_v38  ;;  %v1963_v40 = vld [vmem:[%s2553_s3 + $0x40] sm:$0xff]   ;;  %650 = vmatprep.mubr.bf16.mxu0 %v352_v35  ;;  %v1968_v45 = vld [vmem:[%s2553_s3 + $0xc8] sm:$0xff]   ;;  %v1972_v49 = vld [vmem:[%s2553_s3 + $0xd0] sm:$0xff]   ;;  %s2063_s13 = scalar_lea.vmem %s2510_s23, 16  ;;  %p2070_p2 = scmp.lt.s32.totalorder %s2510_s23, %s2068_s28 }
  0x42   : > { %690 = vmatprep.mubr.bf16.mxu1 %v354_v36  ;;  %v1964_v41 = vld [vmem:[%s2553_s3 + $0xc0] sm:$0xff]   ;;  %v1969_v46 = vld [vmem:[%s2553_s3 + $0x8] sm:$0xff]   ;;  %v1973_v50 = vld [vmem:[%s2553_s3 + $0x10] sm:$0xff]   ;;  %p2064_p6 = scmp.ne.s32.totalorder %s2510_s23, %s2063_s13  ;;  %p2071_p3 = scmp.lt.s32.totalorder %s2069_s29, %s2063_s13 }
  0x43   : > { %1723 = vmatpush3.bf16.msra.mxu0 %v1945_v14  ;;  %v1965_v42 = vld [vmem:[%s2553_s3] sm:$0xff]   ;;  %v1970_v47 = vld [vmem:[%s2553_s3 + $0x88] sm:$0xff]   ;;  %v1974_v51 = vld [vmem:[%s2553_s3 + $0x90] sm:$0xff]  }
  0x44   : > { %1745 = vmatpush3.bf16.msra.mxu1 %v1946_v15  ;;  %1724 = vmatprep.subr.bf16.mxu0 %v1947_v16  ;;  %v1966_v43 = vld [vmem:[%s2553_s3 + $0x80] sm:$0xff]   ;;  %v1975_v52 = vld [vmem:[%s2553_s3 + $0x58] sm:$0xff]   ;;  %v1983_v60 = vld [vmem:[%s2553_s3 + $0x68] sm:$0xff]   ;;  %p2065_p10 = pnand %p2064_p6, %p2570_p9  ;;  %p2072_p4 = por %p2071_p3, %p2070_p2 }
  0x45   : > { %1746 = vmatprep.subr.bf16.mxu1 %v1948_v17  ;;  %v1976_v53 = vld [vmem:[%s2553_s3 + $0xd8] sm:$0xff]   ;;  %v1979_v56 = vld [vmem:[%s2553_s3 + $0x60] sm:$0xff]   ;;  %v1984_v61 = vld [vmem:[%s2553_s3 + $0xe8] sm:$0xff]  }
  0x46   : > { %v1977_v54 = vld [vmem:[%s2553_s3 + $0x18] sm:$0xff]   ;;  %v1980_v57 = vld [vmem:[%s2553_s3 + $0xe0] sm:$0xff]   ;;  %v1985_v62 = vld [vmem:[%s2553_s3 + $0x28] sm:$0xff]   ;;  %p2066_p12 = pneg %p2065_p10 }
  0x47   : > { %1725 = vmatpush3.bf16.msra.mxu0 %v1949_v18  ;;  %v1978_v55 = vld [vmem:[%s2553_s3 + $0x98] sm:$0xff]   ;;  %v1981_v58 = vld [vmem:[%s2553_s3 + $0x20] sm:$0xff]   ;;  %v1986_v63 = vld [vmem:[%s2553_s3 + $0xa8] sm:$0xff]  }
  0x48   : > { %1747 = vmatpush3.bf16.msra.mxu1 %v1950_v19  ;;  %1726 = vmatprep.subr.bf16.mxu0 %v1951_v20  ;;  %v1982_v59 = vld [vmem:[%s2553_s3 + $0xa0] sm:$0xff]   ;;  %v1987_v0 = vld [vmem:[%s2553_s3 + $0x70] sm:$0xff]   ;;  %v1991_v4 = vld [vmem:[%s2553_s3 + $0x78] sm:$0xff]   ;;  %p2073_p7 = pnand %p2072_p4, %p2066_p12 }
  0x49   : > { %1748 = vmatprep.subr.bf16.mxu1 %v1952_v21  ;;  %v1988_v1 = vld [vmem:[%s2553_s3 + $0xf0] sm:$0xff]   ;;  %v1992_v5 = vld [vmem:[%s2553_s3 + $0xf8] sm:$0xff]   ;;  %v1995_v8 = vld [vmem:[#allocation2 + $0x40] sm:$0xff]  }
  0x4a   : > { %v1989_v2 = vld [vmem:[%s2553_s3 + $0x30] sm:$0xff]   ;;  %v1993_v6 = vld [vmem:[%s2553_s3 + $0x38] sm:$0xff]   ;;  %v1996_v9 = vld [vmem:[#allocation2 + $0xc0] sm:$0xff]  }
  0x4b   : > { %1727 = vmatpush3.bf16.msra.mxu0 %v1953_v22  ;;  %v1990_v3 = vld [vmem:[%s2553_s3 + $0xb0] sm:$0xff]   ;;  %v1994_v7 = vld [vmem:[%s2553_s3 + $0xb8] sm:$0xff]   ;;  %v1606_v12 = vld [vmem:[%s2552_s2] ss:$0 sm:$0xff] }
  0x4c   : > { %1749 = vmatpush3.bf16.msra.mxu1 %v1954_v23  ;;  %1728 = vmatprep.subr.bf16.mxu0 %v1955_v24  ;;  %v1998_v32 = vld [vmem:[#allocation2 + $0x80] sm:$0xff]   ;;  %v1999_v34 = vld [vmem:[#allocation2 + $0x48] sm:$0xff]   ;;  %v2003_v38 = vld [vmem:[#allocation2 + $0x50] sm:$0xff]  }
  0x4d   : > { %1750 = vmatprep.subr.bf16.mxu1 %v1956_v25  ;;  %v2000_v35 = vld [vmem:[#allocation2 + $0xc8] sm:$0xff]  }
  0x4e   : > { %v2001_v36 = vld [vmem:[#allocation2 + $0x8] sm:$0xff]  }
  0x4f   : > { %1729 = vmatpush3.bf16.msra.mxu0 %v1957_v26 }
  0x50   : > { %1751 = vmatpush3.bf16.msra.mxu1 %v1958_v27  ;;  %1730 = vmatprep.subr.bf16.mxu0 %v1959_v28 }
  0x51   : > { %1752 = vmatprep.subr.bf16.mxu1 %v1960_v29 }
  0x53   : > { %1731 = vmatpush3.bf16.msra.mxu0 %v1961_v30 }
  0x54   : > { %1753 = vmatpush3.bf16.msra.mxu1 %v1962_v31  ;;  %1760 = vmatprep.subr.bf16.mxu0 %v1963_v40  ;;  %v1997_v31 = vld [vmem:[#allocation2] sm:$0xff]   ;;  %v2005_v40 = vld [vmem:[#allocation2 + $0x10] sm:$0xff]  }
  0x55   : > { %1782 = vmatprep.subr.bf16.mxu1 %v1964_v41  ;;  %v2006_v41 = vld [vmem:[#allocation2 + $0x90] sm:$0xff]  }
  0x56   : > { %651 = vmatmul.mubr.bf16.vlgmr.msra.gmra.mrb[0].mxu0 %v351_v37  ;;  %v2002_v37 = vld [vmem:[#allocation2 + $0x88] sm:$0xff]  }
  0x57   : > { %691 = vmatmul.mubr.bf16.vlgmr.msra.gmra.mrb[0].mxu1 %v353_v39  ;;  %1761 = vmatpush3.bf16.msra.mxu0 %v1965_v42  ;;  %v2004_v39 = vld [vmem:[#allocation2 + $0xd0] sm:$0xff]   ;;  %v2007_v42 = vld [vmem:[#allocation2 + $0x58] sm:$0xff]  }
  0x58   : > { %1783 = vmatpush3.bf16.msra.mxu1 %v1966_v43  ;;  %1762 = vmatprep.subr.bf16.mxu0 %v1967_v44  ;;  %v2008_v43 = vld [vmem:[#allocation2 + $0xd8] sm:$0xff]  }
  0x59   : > { %1784 = vmatprep.subr.bf16.mxu1 %v1968_v45  ;;  %v2009_v44 = vld [vmem:[#allocation2 + $0x18] sm:$0xff]  }
  0x5a   : > { %v2010_v45 = vld [vmem:[#allocation2 + $0x98] sm:$0xff]  }
  0x5b   : > { %1763 = vmatpush3.bf16.msra.mxu0 %v1969_v46  ;;  %v2011_v46 = vld [vmem:[#allocation2 + $0x60] sm:$0xff]  }
  0x5c   : > { %1785 = vmatpush3.bf16.msra.mxu1 %v1970_v47  ;;  %1764 = vmatprep.subr.bf16.mxu0 %v1971_v48  ;;  %v2012_v47 = vld [vmem:[#allocation2 + $0xe0] sm:$0xff]  }
  0x5d   : > { %1786 = vmatprep.subr.bf16.mxu1 %v1972_v49  ;;  %v2013_v48 = vld [vmem:[#allocation2 + $0x20] sm:$0xff]  }
  0x5e   : > { %v2014_v49 = vld [vmem:[#allocation2 + $0xa0] sm:$0xff]  }
  0x5f   : > { %1765 = vmatpush3.bf16.msra.mxu0 %v1973_v50  ;;  %v2015_v50 = vld [vmem:[#allocation2 + $0x68] sm:$0xff]  }
  0x60   : > { %1787 = vmatpush3.bf16.msra.mxu1 %v1974_v51  ;;  %1766 = vmatprep.subr.bf16.mxu0 %v1975_v52  ;;  %v2016_v51 = vld [vmem:[#allocation2 + $0xe8] sm:$0xff]  }
  0x61   : > { %1788 = vmatprep.subr.bf16.mxu1 %v1976_v53  ;;  %v2017_v52 = vld [vmem:[#allocation2 + $0x28] sm:$0xff]  }
  0x62   : > { %v2018_v53 = vld [vmem:[#allocation2 + $0xa8] sm:$0xff]  }
  0x63   : > { %1767 = vmatpush3.bf16.msra.mxu0 %v1977_v54  ;;  %v2019_v54 = vld [vmem:[#allocation2 + $0x70] sm:$0xff]  }
  0x64   : > { %1789 = vmatpush3.bf16.msra.mxu1 %v1978_v55  ;;  %1768 = vmatprep.subr.bf16.mxu0 %v1979_v56  ;;  %v2020_v55 = vld [vmem:[#allocation2 + $0xf0] sm:$0xff]  }
  0x65   : > { %1790 = vmatprep.subr.bf16.mxu1 %v1980_v57  ;;  %v2021_v56 = vld [vmem:[#allocation2 + $0x30] sm:$0xff]  }
  0x66   : > { %v2022_v57 = vld [vmem:[#allocation2 + $0xb0] sm:$0xff]  }
  0x67   : > { %1769 = vmatpush3.bf16.msra.mxu0 %v1981_v58  ;;  %v2023_v58 = vld [vmem:[#allocation2 + $0x78] sm:$0xff]  }
  0x68   : > { %1791 = vmatpush3.bf16.msra.mxu1 %v1982_v59  ;;  %1770 = vmatprep.subr.bf16.mxu0 %v1983_v60  ;;  %v2024_v59 = vld [vmem:[#allocation2 + $0xf8] sm:$0xff]  }
  0x69   : > { %1792 = vmatprep.subr.bf16.mxu1 %v1984_v61  ;;  %v2025_v60 = vld [vmem:[#allocation2 + $0x38] sm:$0xff]  }
  0x6a   : > { %v2026_v61 = vld [vmem:[#allocation2 + $0xb8] sm:$0xff]  }
  0x6b   : > { %1771 = vmatpush3.bf16.msra.mxu0 %v1985_v62  ;;  %v2134_v62 = vmov 0.0  }
  0x6c   : > { %1793 = vmatpush3.bf16.msra.mxu1 %v1986_v63  ;;  %1772 = vmatprep.subr.bf16.mxu0 %v1987_v0 }
  0x6d   : > { %1794 = vmatprep.subr.bf16.mxu1 %v1988_v1  ;;  %v1639_v1 = vld [vmem:[%s2554_s4] ss:$0 sm:$0xff] }
  0x6f   : > { %1773 = vmatpush3.bf16.msra.mxu0 %v1989_v2 }
  0x70   : > { %1795 = vmatpush3.bf16.msra.mxu1 %v1990_v3  ;;  %1774 = vmatprep.subr.bf16.mxu0 %v1991_v4 }
  0x71   : > { %1796 = vmatprep.subr.bf16.mxu1 %v1992_v5 }
  0x73   : > { %1775 = vmatpush3.bf16.msra.mxu0 %v1993_v6 }
  0x74   : > { %1797 = vmatpush3.bf16.msra.mxu1 %v1994_v7  ;;  %1804 = vmatprep.subr.bf16.mxu0 %v1995_v8 }
  0x75   : > { %1826 = vmatprep.subr.bf16.mxu1 %v1996_v9 }
 0x129   : > { %v1732_v10 = vpop.f32.mrb[0].mxu0 }
 0x12a   : > { %v1754_v11 = vpop.f32.mrb[0].mxu1  ;;  %v1733_v13 = vpop.f32.mrb[1].mxu0 }
 0x12b   : > { %v1755_v14 = vpop.f32.mrb[1].mxu1  ;;  %v1734_v15 = vadd.f32 %v1733_v13, %v1732_v10  ;;  %v1735_v17 = vpop.f32.mrb[2].mxu0 }
 0x12c   : > { %v1756_v16 = vadd.f32 %v1755_v14, %v1754_v11  ;;  %v1757_v18 = vpop.f32.mrb[2].mxu1  ;;  %v1736_v19 = vpop.f32.mrb[3].mxu0 }
 0x12d   : > { %v1758_v20 = vpop.f32.mrb[3].mxu1  ;;  %v653_v21 = vadd.f32 %v1734_v15, %v1606_v12 }
 0x12e   : > { %v2027_v20 = vld [vmem:[%s2557_s7] sm:$0xff]  }
 0x12f   : > { %v693_v22 = vadd.f32 %v1756_v16, %v653_v21 }
 0x131   : > { %vm698_vm0 = vcmp.gt.f32.partialorder %v693_v22, 0.0  ;;  %v699_v23 = vmul.f32 0.01, %v693_v22 }
 0x133   : > { %v700_v24 = vsel %vm698_vm0, %v693_v22, %v699_v23  ;;  %v2028_v22 = vld [vmem:[%s2557_s7 + $0x8] sm:$0xff]   ;;  %v2029_v23 = vld [vmem:[%s2557_s7 + $0x10] sm:$0xff]  }
 0x134   : > { %v702_v25 = vrot.slane %v700_v24, 1  ;;  %v706_v26 = vrot.slane %v700_v24, 3  ;;  %v704_v27 = vrot.slane %v700_v24, 2  ;;  %v708_v33 = vpack.c.bf16 %v700_v24, %v700_v24  ;;  %v2030_v24 = vld [vmem:[%s2557_s7 + $0x18] sm:$0xff]  }
 0x136   : > { %v709_v28 = vpack.c.bf16 %v702_v25, %v702_v25  ;;  %v711_v29 = vpack.c.bf16 %v706_v26, %v706_v26  ;;  %v710_v30 = vpack.c.bf16 %v704_v27, %v704_v27  ;;  %v2031_v25 = vld [vmem:[%s2557_s7 + $0x20] sm:$0xff]   ;;  %v2032_v26 = vld [vmem:[%s2557_s7 + $0x28] sm:$0xff]   ;;  %v2033_v27 = vld [vmem:[%s2557_s7 + $0x30] sm:$0xff]  }
 0x138   : > { %1007 = vmatprep.mubr.bf16.mxu0 %v709_v28  ;;  %1047 = vmatprep.mubr.bf16.mxu1 %v711_v29  ;;  %v2034_v28 = vld [vmem:[%s2557_s7 + $0x38] sm:$0xff]  }
 0x139   : > { %1008 = vmatmul.mubr.bf16.vlgmr.msra.gmra.mrb[4].mxu0 %v708_v33  ;;  %1048 = vmatmul.mubr.bf16.vlgmr.msra.gmra.mrb[4].mxu1 %v710_v30 }
 0x13a   : > { %1805 = vmatpush3.bf16.msra.mxu0 %v1997_v31  ;;  %1827 = vmatpush3.bf16.msra.mxu1 %v1998_v32  ;;  %v1133_v31 = vld [vmem:[%s2556_s6] sm:$0x1] }
 0x13b   : > { %1806 = vmatprep.subr.bf16.mxu0 %v1999_v34  ;;  %1828 = vmatprep.subr.bf16.mxu1 %v2000_v35 }
 0x13e   : > { %1807 = vmatpush3.bf16.msra.mxu0 %v2001_v36  ;;  %1829 = vmatpush3.bf16.msra.mxu1 %v2002_v37 }
 0x13f   : > { %1808 = vmatprep.subr.bf16.mxu0 %v2003_v38  ;;  %1830 = vmatprep.subr.bf16.mxu1 %v2004_v39 }
 0x142   : > { %1809 = vmatpush3.bf16.msra.mxu0 %v2005_v40  ;;  %1831 = vmatpush3.bf16.msra.mxu1 %v2006_v41 }
 0x143   : > { %1810 = vmatprep.subr.bf16.mxu0 %v2007_v42  ;;  %1832 = vmatprep.subr.bf16.mxu1 %v2008_v43 }
 0x146   : > { %1811 = vmatpush3.bf16.msra.mxu0 %v2009_v44  ;;  %1833 = vmatpush3.bf16.msra.mxu1 %v2010_v45  ;;  %v1426_v45 = vld [vmem:[%s2558_s8] sm:$0x1] }
 0x147   : > { %1812 = vmatprep.subr.bf16.mxu0 %v2011_v46  ;;  %1834 = vmatprep.subr.bf16.mxu1 %v2012_v47 }
 0x14a   : > { %1813 = vmatpush3.bf16.msra.mxu0 %v2013_v48  ;;  %1835 = vmatpush3.bf16.msra.mxu1 %v2014_v49 }
 0x14b   : > { %1814 = vmatprep.subr.bf16.mxu0 %v2015_v50  ;;  %1836 = vmatprep.subr.bf16.mxu1 %v2016_v51 }
 0x14e   : > { %1815 = vmatpush3.bf16.msra.mxu0 %v2017_v52  ;;  %1837 = vmatpush3.bf16.msra.mxu1 %v2018_v53 }
 0x14f   : > { %1816 = vmatprep.subr.bf16.mxu0 %v2019_v54  ;;  %1838 = vmatprep.subr.bf16.mxu1 %v2020_v55 }
 0x152   : > { %1817 = vmatpush3.bf16.msra.mxu0 %v2021_v56  ;;  %1839 = vmatpush3.bf16.msra.mxu1 %v2022_v57 }
 0x153   : > { %1818 = vmatprep.subr.bf16.mxu0 %v2023_v58  ;;  %1840 = vmatprep.subr.bf16.mxu1 %v2024_v59 }
 0x156   : > { %1819 = vmatpush3.bf16.msra.mxu0 %v2025_v60  ;;  %1841 = vmatpush3.bf16.msra.mxu1 %v2026_v61 }
 0x157   : > { %1857 = vmatprep.subr.bf16.mxu0 %v2134_v62 }
 0x20c   : > { %v1776_v63 = vpop.f32.mrb[4].mxu0  ;;  %v1798_v0 = vpop.f32.mrb[4].mxu1 }
 0x20d   : > { %v1777_v2 = vpop.f32.mrb[5].mxu0  ;;  %v1799_v3 = vpop.f32.mrb[5].mxu1 }
 0x20e   : > { %v1778_v4 = vadd.f32 %v1777_v2, %v1776_v63  ;;  %v1800_v5 = vadd.f32 %v1799_v3, %v1798_v0  ;;  %v1779_v6 = vpop.f32.mrb[6].mxu0  ;;  %v1801_v7 = vpop.f32.mrb[6].mxu1 }
 0x20f   : > { %v1780_v8 = vpop.f32.mrb[7].mxu0  ;;  %v1802_v9 = vpop.f32.mrb[7].mxu1 }
 0x210   : > { %v1010_v10 = vadd.f32 %v1778_v4, %v1639_v1 }
 0x212   : > { %v1050_v11 = vadd.f32 %v1800_v5, %v1010_v10 }
 0x214   : > { %vm1055_vm1 = vcmp.gt.f32.partialorder %v1050_v11, 0.0  ;;  %v1056_v12 = vmul.f32 0.01, %v1050_v11 }
 0x216   : > { %v1057_v13 = vsel %vm1055_vm1, %v1050_v11, %v1056_v12 }
 0x217   : > { %v1059_v14 = vrot.slane %v1057_v13, 1  ;;  %v1063_v15 = vrot.slane %v1057_v13, 3  ;;  %v1061_v16 = vrot.slane %v1057_v13, 2  ;;  %v1065_v21 = vpack.c.bf16 %v1057_v13, %v1057_v13 }
 0x219   : > { %v1066_v17 = vpack.c.bf16 %v1059_v14, %v1059_v14  ;;  %v1068_v18 = vpack.c.bf16 %v1063_v15, %v1063_v15  ;;  %v1067_v19 = vpack.c.bf16 %v1061_v16, %v1061_v16 }
 0x21b   : > { %1358 = vmatprep.mubr.bf16.mxu0 %v1066_v17  ;;  %1398 = vmatprep.mubr.bf16.mxu1 %v1068_v18 }
 0x21c   : > { %1359 = vmatmul.mubr.bf16.vlgmr.msra.gmra.mrb[8].mxu0 %v1065_v21  ;;  %1399 = vmatmul.mubr.bf16.vlgmr.msra.gmra.mrb[8].mxu1 %v1067_v19 }
 0x21d   : > { %1858 = vmatpush3.bf16.msra.mxu0 %v2027_v20  ;;  %1873 = vmatprep.mubr.msk.bf16.mxu0 %vm2135_vm2, %v2134_v62 }
 0x21e   : > { %1859 = vmatprep.subr.bf16.mxu0 %v2134_v62 }
 0x221   : > { %1860 = vmatpush3.bf16.msra.mxu0 %v2028_v22 }
 0x222   : > { %1861 = vmatprep.subr.bf16.mxu0 %v2134_v62 }
 0x225   : > { %1862 = vmatpush3.bf16.msra.mxu0 %v2029_v23 }
 0x226   : > { %1863 = vmatprep.subr.bf16.mxu0 %v2134_v62 }
 0x229   : > { %1864 = vmatpush3.bf16.msra.mxu0 %v2030_v24 }
 0x22a   : > { %1865 = vmatprep.subr.bf16.mxu0 %v2134_v62 }
 0x22d   : > { %1866 = vmatpush3.bf16.msra.mxu0 %v2031_v25 }
 0x22e   : > { %1867 = vmatprep.subr.bf16.mxu0 %v2134_v62 }
 0x231   : > { %1868 = vmatpush3.bf16.msra.mxu0 %v2032_v26 }
 0x232   : > { %1869 = vmatprep.subr.bf16.mxu0 %v2134_v62 }
 0x235   : > { %1870 = vmatpush3.bf16.msra.mxu0 %v2033_v27 }
 0x236   : > { %1871 = vmatprep.subr.bf16.mxu0 %v2134_v62 }
 0x239   : > { %1872 = vmatpush3.bf16.msra.mxu0 %v2034_v28 }
 0x2ef   : > { %v1820_v29 = vpop.f32.mrb[8].mxu0  ;;  %v1842_v30 = vpop.f32.mrb[8].mxu1 }
 0x2f0   : > { %v1821_v32 = vpop.f32.mrb[9].mxu0  ;;  %v1843_v33 = vpop.f32.mrb[9].mxu1 }
 0x2f1   : > { %v1822_v34 = vadd.f32 %v1821_v32, %v1820_v29  ;;  %v1844_v35 = vadd.f32 %v1843_v33, %v1842_v30  ;;  %v1823_v36 = vpop.f32.mrb[10].mxu0  ;;  %v1845_v37 = vpop.f32.mrb[10].mxu1 }
 0x2f2   : > { %v1824_v38 = vpop.f32.mrb[11].mxu0  ;;  %v1846_v39 = vpop.f32.mrb[11].mxu1 }
 0x2f3   : > { %v1361_v40 = vadd.f32 %v1822_v34, %v1133_v31 }
 0x2f5   : > { %v1401_v41 = vadd.f32 %v1844_v35, %v1361_v40 }
 0x2f7   : > { %vm1406_vm3 = vcmp.gt.f32.partialorder %v1401_v41, 0.0  ;;  %v1407_v42 = vmul.f32 0.01, %v1401_v41 }
 0x2f9   : > { %v1408_v43 = vsel %vm1406_vm3, %v1401_v41, %v1407_v42 }
 0x2fa   : > { %v1409_v44 = vpack.c.bf16 %v1408_v43, %v1408_v43 }
 0x2fc   : > { %1874 = vmatmul.mubr.bf16.vlgmr.msra.gmra.mrb[12].mxu0 %v1409_v44 }
 0x3cf   : > { %v1509_v46 = vpop.f32.mrb[12].mxu0 }
 0x3d0   : > { %v1510_v47 = vadd.f32 %v1509_v46, %v1426_v45  ;;  %v1875_v48 = vpop.f32.mrb[13].mxu0 }
 0x3d1   : > { %v1512_v49 = vpop.f32.mrb[14].mxu0 }
 0x3d2   : > { %1515 = vst [vmem:[%s339_s24] sm:$0x1] %v1510_v47  ;;  %v1876_v50 = vpop.f32.mrb[15].mxu0 }
 0x3d3   : > { %2076 = shalt.err (!%p2073_p7)
}
 0x3d4   : > { %s2077_s27 = scalar_lea.hbm %s2508_s22, 16  ;;  %s2081_s24 = scalar_lea.hbm %s2559_s9, 32 }
 0x3d5   : > { %p2078_p8 = scmp.ne.s32.totalorder %s2508_s22, %s2077_s27  ;;  %p2082_p1 = scmp.lt.u32.totalorder %s2508_s22, %s2559_s9 }
 0x3d6   : > { %p2083_p0 = scmp.lt.u32.totalorder %s2081_s24, %s2077_s27  ;;  %p2085_p6 = scmp.lt.u32.totalorder %s2077_s27, %s2508_s22 }
 0x3d7   : > { %p2079_p11 = pnand %p2078_p8, %p2570_p9 }
 0x3d8   : > { %p2084_p5 = por %p2083_p0, %p2082_p1 }
 0x3d9   : > { %p2080_p13 = pneg %p2079_p11 }
 0x3da   : > { %p2086_p10 = por %p2085_p6, %p2084_p5 }
 0x3dc   : > { %p2087_p12 = pnand %p2086_p10, %p2080_p13 }
 0x3de   : > { %2090 = shalt.err (!%p2087_p12)
}
 0x3df   : > { %1881 = dma.vmem_to_hbm [thread:$0]  (%p2570_p9), %s2510_s23, 16, %s2508_s22, %s1517_s25  }
 0x3e0 PF: > { %p1893_p2 = scmp.ge.s32.totalorder %s2129_s12, 2  ;;  %s1541_s13 = sand.u32 1, %s2117_s30  }
 0x3e1   : > { %p2571_p3 = scmp.ne.s32.totalorder %s2564_s20, 0  ;;  %s1542_s17 = scalar_lea.sflag [#allocation4], %s1541_s13 }
 0x3e3   : > { %p1888_p4 = pnand %p1893_p2, %p2571_p3 }
 0x3e5   : > { %2112 = dma.done.wait (!%p1888_p4), %s1542_s17, 16  }
 0x3e6   : > { %2114 = vsyncadd (!%p1888_p4), %s1542_s17, 4294967280  ;;  %p20_p7 = scmp.ge.s32.totalorder %s2212_s15, 4   ;;  %s2572_s30 = smov %s2121_s10 }
 0x3e7   : > { %s2573_s10 = smov %s2125_s11  ;;  %s2574_s11 = smov %s2223_s18 }
 0x3e8   : > { %s2575_s12 = smov %s2212_s15  ;;  %22 = sbr.rel (!%p20_p7) target bundleno = 4 (0x4), region = 97 }
 0x3ef   :  { %1546 = vsyncpa [#allocation3], 1 }
 0x3f0   :  { %1548 = vsyncpa [#allocation3 + $0x1], 1 }
 0x3f1   :  { %1549 = vsyncpa [#allocation4], 1 }
 0x3f2   :  { %1551 = vsyncpa [#allocation4 + $0x1], 1 }

</bundles_post_ra>
